<compile_context>
chip_gen: v7x
topology: tpu7x:2x2x1
jax: 0.10.0
libtpu: 0.0.40
codegen_flags: <defaults>
</compile_context>

<pallas_src>
import jax
import jax.numpy as jnp
from jax.experimental import pallas as pl
from jax.experimental.pallas import tpu as pltpu

_LANES = 128
_SMALL_C_MAX = 16   # up to here the channel mix stays on the VPU (scalar-weight FMAs)


def _sigmoid(v):
    # exp() goes to the EUP slot (which has slack); exact reciprocal keeps bit-level
    # parity with the f32 reference.  approx=True would be ~free but costs ~1e-4 acc.
    return pl.reciprocal(1.0 + jnp.exp(-v), approx=False)


# --------------------------------------------------------------------------------------
# Small-C path: full-density (ROWS, 128) slabs + scalar-weight FMAs, weights in SMEM.
# --------------------------------------------------------------------------------------
def _small_c_kernel(x_ref, w0_ref, b0_ref, w1_ref, b1_ref, o_ref):
    # x_ref / o_ref : (1, C, ROWS, 128) VMEM tiles (lane- and sublane-dense slabs).
    # w*_ref        : (C, C) in SMEM; b*_ref: (C,) in SMEM -- read as scalars.
    C = x_ref.shape[1]
    x = [x_ref[0, ci].astype(jnp.float32) for ci in range(C)]   # C slabs of (ROWS, 128)

    def mix_sigmoid(v, w_ref, b_ref):
        out = []
        for co in range(C):
            # Bias folded into the first FMA; scalar weights splat from SMEM, so there
            # is no (1,T)->(C,T) sublane-broadcast or (C,1)->(C,T) lane-broadcast.
            acc = v[0] * w_ref[co, 0] + b_ref[co]
            for ci in range(1, C):
                acc = acc + v[ci] * w_ref[co, ci]
            out.append(_sigmoid(acc))
        return out

    h = mix_sigmoid(x, w0_ref, b0_ref)
    y = mix_sigmoid(h, w1_ref, b1_ref)
    for co in range(C):
        o_ref[0, co] = y[co].astype(o_ref.dtype)


def _choose_rows(r, n_batch, c, itemsize, *, rows_cap=512, budget=8 * 1024 * 1024):
    """Sublane-tile height: a multiple of 8, or the full extent r (always legal).

    Sized so the double-buffered in/out tiles plus the f32 slabs the kernel keeps live
    fit `budget`, capped at `rows_cap` (past ~512 rows the HBM-roofline gain is <1-2%
    but VMEM pressure keeps growing), and small enough that the grid has >= 4 steps so
    both v7x TensorCores get work.
    """
    # Per tile-row: 2 buffers each of the input & output tile (I/O dtype) plus the
    # fp32 x / h / acc slabs held live inside the kernel.
    bytes_per_row = _LANES * (4 * c * itemsize + (2 * c + 1) * 4)
    rows = max(8, min(rows_cap, budget // bytes_per_row) // 8 * 8)
    if r <= rows:
        if n_batch >= 2 or r < 16:
            return r                                   # full-extent column block
        rows = max(8, ((r + 1) // 2 + 7) // 8 * 8)     # split so a 2nd core has work
    # Keep >= 4 grid steps (2 TensorCores on v7x + pipelining headroom).
    while n_batch * pl.cdiv(r, rows) < 4 and rows > 8:
        rows = max(8, (rows // 2) // 8 * 8)
    # Prefer a height dividing r exactly (no masked tail) if it stays >= half target.
    d = rows
    while d >= 8 and r % d:
        d -= 8
    if d >= max(8, rows // 2):
        rows = d
    return rows


def _forward_small_c(x_nchw, w0_mat, b0, w1_mat, b1):
    N, C, H, W = x_nchw.shape
    HW = H * W
    R = pl.cdiv(HW, _LANES)
    hw_pad = R * _LANES

    x3 = x_nchw.reshape(N, C, HW)
    if hw_pad != HW:
        # One-time lane-alignment pad (only when H*W % 128 != 0); sliced off below.
        x3 = jnp.pad(x3, ((0, 0), (0, 0), (0, hw_pad - HW)))
    x4 = x3.reshape(N, C, R, _LANES)        # free reshape: no transpose, no copy

    rows = _choose_rows(R, N, C, x4.dtype.itemsize)
    grid = (N, pl.cdiv(R, rows))            # partial last row-block is masked by Pallas

    # Weights / biases as f32 scalars in SMEM (tiny: a (C,C) block pads to (8,128) words).
    w0_s = w0_mat.astype(jnp.float32)
    w1_s = w1_mat.astype(jnp.float32)
    b0_s = b0.astype(jnp.float32)
    b1_s = b1.astype(jnp.float32)

    # Explicit VMEM limit: double-buffered in/out tiles + live f32 slabs + headroom.
    tile_bytes = 4 * C * rows * _LANES * x4.dtype.itemsize
    live_f32 = (2 * C + 1) * rows * _LANES * 4
    vmem_limit = int(min(32 << 20, max(16 << 20, tile_bytes + live_f32 + (4 << 20))))

    out4 = pl.pallas_call(
        _small_c_kernel,
        out_shape=jax.ShapeDtypeStruct((N, C, R, _LANES), x4.dtype),
        grid_spec=pltpu.PrefetchScalarGridSpec(
            num_scalar_prefetch=0,
            grid=grid,
            in_specs=[
                pl.BlockSpec((1, C, rows, _LANES), lambda n, j: (n, 0, j, 0)),   # x
                pl.BlockSpec(memory_space=pltpu.MemorySpace.SMEM),               # W0
                pl.BlockSpec(memory_space=pltpu.MemorySpace.SMEM),               # b0
                pl.BlockSpec(memory_space=pltpu.MemorySpace.SMEM),               # W1
                pl.BlockSpec(memory_space=pltpu.MemorySpace.SMEM),               # b1
            ],
            out_specs=pl.BlockSpec((1, C, rows, _LANES), lambda n, j: (n, 0, j, 0)),
        ),
        compiler_params=pltpu.CompilerParams(
            dimension_semantics=("parallel", "parallel"),
            vmem_limit_bytes=vmem_limit),
    )(x4, w0_s, b0_s, w1_s, b1_s)

    out3 = out4.reshape(N, C, hw_pad)
    if hw_pad != HW:
        out3 = out3[:, :, :HW]
    return out3.reshape(N, C, H, W)


# --------------------------------------------------------------------------------------
# Large-C fallback (C > 16): lane-dense (C, HW) layout, channel mix on the MXU.
# --------------------------------------------------------------------------------------
def _mxu_kernel(x_ref, w0_ref, b0_ref, w1_ref, b1_ref, o_ref):
    # x_ref/o_ref: (1, C, T) lane-dense tiles; w*: (C, C), b*: (C, 1) resident in VMEM.
    x = x_ref[0].astype(jnp.float32)
    w0 = w0_ref[...].astype(jnp.float32)
    b0 = b0_ref[...].astype(jnp.float32)
    w1 = w1_ref[...].astype(jnp.float32)
    b1 = b1_ref[...].astype(jnp.float32)
    h = _sigmoid(jnp.dot(w0, x, preferred_element_type=jnp.float32) + b0)
    y = _sigmoid(jnp.dot(w1, h, preferred_element_type=jnp.float32) + b1)
    o_ref[0] = y.astype(o_ref.dtype)


def _sublane_multiple(itemsize):
    return max(8, 32 // itemsize)           # 8 for f32, 16 for bf16, 32 for int8


def _pick_tile_cols(hw, n_batch, c_pad, itemsize, *, max_tile_cols=8192,
                    budget=10 * 1024 * 1024):
    """Lane tile (multiple of 128 dividing hw) for the (C, HW) MXU path, budgeted on
    the sublane-padded channel count (hw must already be a multiple of 128)."""
    bytes_per_col = c_pad * (4 * itemsize + 2 * 4)   # 2x2 I/O buffers + f32 x/h slabs
    max_by_vmem = max(_LANES, (budget // bytes_per_col) // _LANES * _LANES)
    t = min(hw, max_tile_cols, max_by_vmem)
    t = max(_LANES, t // _LANES * _LANES)
    while hw % t:
        t -= _LANES
    # Keep >= 4 grid steps for v7x's two TensorCores.
    while n_batch * (hw // t) < 4 and t > _LANES:
        t2 = max(_LANES, (t // 2) // _LANES * _LANES)
        while hw % t2:
            t2 -= _LANES
        if t2 == t:
            break
        t = t2
    return t


def _forward_mxu(x_nchw, w0_mat, b0, w1_mat, b1):
    N, C, H, W = x_nchw.shape
    HW = H * W
    hw_pad = pl.cdiv(HW, _LANES) * _LANES
    x3 = x_nchw.reshape(N, C, HW)
    if hw_pad != HW:
        x3 = jnp.pad(x3, ((0, 0), (0, 0), (0, hw_pad - HW)))

    itemsize = x3.dtype.itemsize
    sub = _sublane_multiple(itemsize)
    c_pad = pl.cdiv(C, sub) * sub
    c_lane = pl.cdiv(C, _LANES) * _LANES
    w_item = w0_mat.dtype.itemsize
    # Two (C,C) weight + two (C,1) bias blocks, double-buffered, sublane/lane padded.
    weight_bytes = 2 * 2 * c_pad * (c_lane + _LANES) * w_item

    tile_cols = _pick_tile_cols(hw_pad, N, c_pad, itemsize,
                                budget=max(2 << 20, (10 << 20) - weight_bytes))
    grid = (N, hw_pad // tile_cols)

    tile_bytes = c_pad * tile_cols * (4 * itemsize + 2 * 4)
    vmem_limit = int(min(48 << 20, max(16 << 20, tile_bytes + weight_bytes + (4 << 20))))

    b0_col = b0.reshape(C, 1)
    b1_col = b1.reshape(C, 1)

    out3 = pl.pallas_call(
        _mxu_kernel,
        out_shape=jax.ShapeDtypeStruct((N, C, hw_pad), x3.dtype),
        grid_spec=pltpu.PrefetchScalarGridSpec(
            num_scalar_prefetch=0,
            grid=grid,
            in_specs=[
                pl.BlockSpec((1, C, tile_cols), lambda n, j: (n, 0, j)),   # x
                pl.BlockSpec((C, C), lambda n, j: (0, 0)),                 # W0
                pl.BlockSpec((C, 1), lambda n, j: (0, 0)),                 # b0
                pl.BlockSpec((C, C), lambda n, j: (0, 0)),                 # W1
                pl.BlockSpec((C, 1), lambda n, j: (0, 0)),                 # b1
            ],
            out_specs=pl.BlockSpec((1, C, tile_cols), lambda n, j: (n, 0, j)),
        ),
        compiler_params=pltpu.CompilerParams(
            dimension_semantics=("parallel", "parallel"),
            vmem_limit_bytes=vmem_limit),
    )(x3, w0_mat, b0_col, w1_mat, b1_col)

    if hw_pad != HW:
        out3 = out3[:, :, :HW]
    return out3.reshape(N, C, H, W)


# --------------------------------------------------------------------------------------
# Public entry point + reference.
# --------------------------------------------------------------------------------------
def sample_module2_forward(x_nchw, w0, b0, w1, b1):
    """x_nchw: (N, C, H, W); w*: (C, C, 1, 1); b*: (C,). Returns (N, C, H, W)."""
    N, C, H, W = x_nchw.shape
    assert w0.shape[0] == w0.shape[1] == C and w1.shape[0] == w1.shape[1] == C, (
        "fused 1x1-conv kernel assumes square channel mixing (C_out == C_in)")
    w0_mat = w0.reshape(C, C)
    w1_mat = w1.reshape(C, C)
    if C <= _SMALL_C_MAX:
        return _forward_small_c(x_nchw, w0_mat, b0, w1_mat, b1)
    return _forward_mxu(x_nchw, w0_mat, b0, w1_mat, b1)


def reference_forward(x_nchw, w0, b0, w1, b1):
    """Pure-JAX reference of the PyTorch module (two 1x1 convs + sigmoids)."""
    N, C, H, W = x_nchw.shape
    xr = jnp.transpose(x_nchw, (0, 2, 3, 1)).reshape(-1, C)
    h = jax.nn.sigmoid(xr @ w0.reshape(C, C).T + b0)
    h = jax.nn.sigmoid(h @ w1.reshape(C, C).T + b1)
    return jnp.transpose(h.reshape(N, H, W, C), (0, 3, 1, 2))


if __name__ == "__main__":
    # Small shapes consistent with the module: batch=2, channels=4, spatial=16.
    N, C, H, W = 2, 4, 16, 16
    key = jax.random.PRNGKey(0)
    kx, kw0, kb0, kw1, kb1 = jax.random.split(key, 5)

    x = jax.random.normal(kx, (N, C, H, W), dtype=jnp.float32)
    # Deterministic synthetic parameters (same shapes as torch.nn.Conv2d(C, C, 1)).
    bound = 1.0 / (C ** 0.5)
    w0 = jax.random.uniform(kw0, (C, C, 1, 1), jnp.float32, -bound, bound)
    b0 = jax.random.uniform(kb0, (C,), jnp.float32, -bound, bound)
    w1 = jax.random.uniform(kw1, (C, C, 1, 1), jnp.float32, -bound, bound)
    b1 = jax.random.uniform(kb1, (C,), jnp.float32, -bound, bound)

    out = sample_module2_forward(x, w0, b0, w1, b1)
    out = jax.block_until_ready(out)

    ref = reference_forward(x, w0, b0, w1, b1)
    assert out.shape == (N, C, H, W)
    assert jnp.allclose(out, ref, atol=1e-5, rtol=1e-5), float(jnp.max(jnp.abs(out - ref)))

    print("KERNEL_OK")
</pallas_src>

<mosaic_0001>
module attributes {stable_mosaic.version = 11 : i64} {
  func.func @_small_c_kernel(%arg0: i32, %arg1: i32, %arg2: memref<1x4x2x128xf32, #tpu.memory_space<vmem>>, %arg3: memref<4x4xf32, #tpu.memory_space<smem>>, %arg4: memref<4xf32, #tpu.memory_space<smem>>, %arg5: memref<4x4xf32, #tpu.memory_space<smem>>, %arg6: memref<4xf32, #tpu.memory_space<smem>>, %arg7: memref<1x4x2x128xf32, #tpu.memory_space<vmem>>) attributes {dimension_semantics = [#tpu.dimension_semantics<parallel>, #tpu.dimension_semantics<parallel>], iteration_bounds = array<i64: 2, 1>, scalar_prefetch = 0 : i64, scratch_operands = 0 : i64, tpu.core_type = #tpu.core_type<tc>, window_params = [{transform_indices = @transform_0, window_bounds = array<i64: 1, 4, 2, 128>}, {transform_indices = @transform_1, window_bounds = array<i64: 4, 4>}, {transform_indices = @transform_2, window_bounds = array<i64: 4>}, {transform_indices = @transform_3, window_bounds = array<i64: 4, 4>}, {transform_indices = @transform_4, window_bounds = array<i64: 4>}, {transform_indices = @transform_5, window_bounds = array<i64: 1, 4, 2, 128>}]} {
    %c0 = arith.constant 0 : index
    %c0_0 = arith.constant 0 : index
    %c0_1 = arith.constant 0 : index
    %c0_2 = arith.constant 0 : index
    %0 = vector.load %arg2[%c0, %c0_0, %c0_1, %c0_2] : memref<1x4x2x128xf32, #tpu.memory_space<vmem>>, vector<1x1x2x128xf32>
    %1 = vector.shape_cast %0 : vector<1x1x2x128xf32> to vector<2x128xf32>
    %c0_3 = arith.constant 0 : index
    %c1 = arith.constant 1 : index
    %c0_4 = arith.constant 0 : index
    %c0_5 = arith.constant 0 : index
    %2 = vector.load %arg2[%c0_3, %c1, %c0_4, %c0_5] : memref<1x4x2x128xf32, #tpu.memory_space<vmem>>, vector<1x1x2x128xf32>
    %3 = vector.shape_cast %2 : vector<1x1x2x128xf32> to vector<2x128xf32>
    %c0_6 = arith.constant 0 : index
    %c2 = arith.constant 2 : index
    %c0_7 = arith.constant 0 : index
    %c0_8 = arith.constant 0 : index
    %4 = vector.load %arg2[%c0_6, %c2, %c0_7, %c0_8] : memref<1x4x2x128xf32, #tpu.memory_space<vmem>>, vector<1x1x2x128xf32>
    %5 = vector.shape_cast %4 : vector<1x1x2x128xf32> to vector<2x128xf32>
    %c0_9 = arith.constant 0 : index
    %c3 = arith.constant 3 : index
    %c0_10 = arith.constant 0 : index
    %c0_11 = arith.constant 0 : index
    %6 = vector.load %arg2[%c0_9, %c3, %c0_10, %c0_11] : memref<1x4x2x128xf32, #tpu.memory_space<vmem>>, vector<1x1x2x128xf32>
    %7 = vector.shape_cast %6 : vector<1x1x2x128xf32> to vector<2x128xf32>
    %c0_12 = arith.constant 0 : index
    %c0_13 = arith.constant 0 : index
    %8 = memref.load %arg3[%c0_12, %c0_13] : memref<4x4xf32, #tpu.memory_space<smem>>
    %9 = vector.broadcast %8 : f32 to vector<2x128xf32>
    %10 = arith.mulf %1, %9 : vector<2x128xf32>
    %c0_14 = arith.constant 0 : index
    %11 = memref.load %arg4[%c0_14] : memref<4xf32, #tpu.memory_space<smem>>
    %12 = vector.broadcast %11 : f32 to vector<2x128xf32>
    %13 = arith.addf %10, %12 : vector<2x128xf32>
    %c0_15 = arith.constant 0 : index
    %c1_16 = arith.constant 1 : index
    %14 = memref.load %arg3[%c0_15, %c1_16] : memref<4x4xf32, #tpu.memory_space<smem>>
    %15 = vector.broadcast %14 : f32 to vector<2x128xf32>
    %16 = arith.mulf %3, %15 : vector<2x128xf32>
    %17 = arith.addf %13, %16 : vector<2x128xf32>
    %c0_17 = arith.constant 0 : index
    %c2_18 = arith.constant 2 : index
    %18 = memref.load %arg3[%c0_17, %c2_18] : memref<4x4xf32, #tpu.memory_space<smem>>
    %19 = vector.broadcast %18 : f32 to vector<2x128xf32>
    %20 = arith.mulf %5, %19 : vector<2x128xf32>
    %21 = arith.addf %17, %20 : vector<2x128xf32>
    %c0_19 = arith.constant 0 : index
    %c3_20 = arith.constant 3 : index
    %22 = memref.load %arg3[%c0_19, %c3_20] : memref<4x4xf32, #tpu.memory_space<smem>>
    %23 = vector.broadcast %22 : f32 to vector<2x128xf32>
    %24 = arith.mulf %7, %23 : vector<2x128xf32>
    %25 = arith.addf %21, %24 : vector<2x128xf32>
    %cst = arith.constant 0.000000e+00 : f32
    %26 = vector.broadcast %cst : f32 to vector<2x128xf32>
    %27 = arith.subf %26, %25 : vector<2x128xf32>
    %28 = math.exp %27 : vector<2x128xf32>
    %cst_21 = arith.constant 1.000000e+00 : f32
    %29 = vector.broadcast %cst_21 : f32 to vector<2x128xf32>
    %30 = arith.addf %29, %28 : vector<2x128xf32>
    %31 = tpu.reciprocal %30 : vector<2x128xf32> -> vector<2x128xf32>
    %c1_22 = arith.constant 1 : index
    %c0_23 = arith.constant 0 : index
    %32 = memref.load %arg3[%c1_22, %c0_23] : memref<4x4xf32, #tpu.memory_space<smem>>
    %33 = vector.broadcast %32 : f32 to vector<2x128xf32>
    %34 = arith.mulf %1, %33 : vector<2x128xf32>
    %c1_24 = arith.constant 1 : index
    %35 = memref.load %arg4[%c1_24] : memref<4xf32, #tpu.memory_space<smem>>
    %36 = vector.broadcast %35 : f32 to vector<2x128xf32>
    %37 = arith.addf %34, %36 : vector<2x128xf32>
    %c1_25 = arith.constant 1 : index
    %c1_26 = arith.constant 1 : index
    %38 = memref.load %arg3[%c1_25, %c1_26] : memref<4x4xf32, #tpu.memory_space<smem>>
    %39 = vector.broadcast %38 : f32 to vector<2x128xf32>
    %40 = arith.mulf %3, %39 : vector<2x128xf32>
    %41 = arith.addf %37, %40 : vector<2x128xf32>
    %c1_27 = arith.constant 1 : index
    %c2_28 = arith.constant 2 : index
    %42 = memref.load %arg3[%c1_27, %c2_28] : memref<4x4xf32, #tpu.memory_space<smem>>
    %43 = vector.broadcast %42 : f32 to vector<2x128xf32>
    %44 = arith.mulf %5, %43 : vector<2x128xf32>
    %45 = arith.addf %41, %44 : vector<2x128xf32>
    %c1_29 = arith.constant 1 : index
    %c3_30 = arith.constant 3 : index
    %46 = memref.load %arg3[%c1_29, %c3_30] : memref<4x4xf32, #tpu.memory_space<smem>>
    %47 = vector.broadcast %46 : f32 to vector<2x128xf32>
    %48 = arith.mulf %7, %47 : vector<2x128xf32>
    %49 = arith.addf %45, %48 : vector<2x128xf32>
    %cst_31 = arith.constant 0.000000e+00 : f32
    %50 = vector.broadcast %cst_31 : f32 to vector<2x128xf32>
    %51 = arith.subf %50, %49 : vector<2x128xf32>
    %52 = math.exp %51 : vector<2x128xf32>
    %cst_32 = arith.constant 1.000000e+00 : f32
    %53 = vector.broadcast %cst_32 : f32 to vector<2x128xf32>
    %54 = arith.addf %53, %52 : vector<2x128xf32>
    %55 = tpu.reciprocal %54 : vector<2x128xf32> -> vector<2x128xf32>
    %c2_33 = arith.constant 2 : index
    %c0_34 = arith.constant 0 : index
    %56 = memref.load %arg3[%c2_33, %c0_34] : memref<4x4xf32, #tpu.memory_space<smem>>
    %57 = vector.broadcast %56 : f32 to vector<2x128xf32>
    %58 = arith.mulf %1, %57 : vector<2x128xf32>
    %c2_35 = arith.constant 2 : index
    %59 = memref.load %arg4[%c2_35] : memref<4xf32, #tpu.memory_space<smem>>
    %60 = vector.broadcast %59 : f32 to vector<2x128xf32>
    %61 = arith.addf %58, %60 : vector<2x128xf32>
    %c2_36 = arith.constant 2 : index
    %c1_37 = arith.constant 1 : index
    %62 = memref.load %arg3[%c2_36, %c1_37] : memref<4x4xf32, #tpu.memory_space<smem>>
    %63 = vector.broadcast %62 : f32 to vector<2x128xf32>
    %64 = arith.mulf %3, %63 : vector<2x128xf32>
    %65 = arith.addf %61, %64 : vector<2x128xf32>
    %c2_38 = arith.constant 2 : index
    %c2_39 = arith.constant 2 : index
    %66 = memref.load %arg3[%c2_38, %c2_39] : memref<4x4xf32, #tpu.memory_space<smem>>
    %67 = vector.broadcast %66 : f32 to vector<2x128xf32>
    %68 = arith.mulf %5, %67 : vector<2x128xf32>
    %69 = arith.addf %65, %68 : vector<2x128xf32>
    %c2_40 = arith.constant 2 : index
    %c3_41 = arith.constant 3 : index
    %70 = memref.load %arg3[%c2_40, %c3_41] : memref<4x4xf32, #tpu.memory_space<smem>>
    %71 = vector.broadcast %70 : f32 to vector<2x128xf32>
    %72 = arith.mulf %7, %71 : vector<2x128xf32>
    %73 = arith.addf %69, %72 : vector<2x128xf32>
    %cst_42 = arith.constant 0.000000e+00 : f32
    %74 = vector.broadcast %cst_42 : f32 to vector<2x128xf32>
    %75 = arith.subf %74, %73 : vector<2x128xf32>
    %76 = math.exp %75 : vector<2x128xf32>
    %cst_43 = arith.constant 1.000000e+00 : f32
    %77 = vector.broadcast %cst_43 : f32 to vector<2x128xf32>
    %78 = arith.addf %77, %76 : vector<2x128xf32>
    %79 = tpu.reciprocal %78 : vector<2x128xf32> -> vector<2x128xf32>
    %c3_44 = arith.constant 3 : index
    %c0_45 = arith.constant 0 : index
    %80 = memref.load %arg3[%c3_44, %c0_45] : memref<4x4xf32, #tpu.memory_space<smem>>
    %81 = vector.broadcast %80 : f32 to vector<2x128xf32>
    %82 = arith.mulf %1, %81 : vector<2x128xf32>
    %c3_46 = arith.constant 3 : index
    %83 = memref.load %arg4[%c3_46] : memref<4xf32, #tpu.memory_space<smem>>
    %84 = vector.broadcast %83 : f32 to vector<2x128xf32>
    %85 = arith.addf %82, %84 : vector<2x128xf32>
    %c3_47 = arith.constant 3 : index
    %c1_48 = arith.constant 1 : index
    %86 = memref.load %arg3[%c3_47, %c1_48] : memref<4x4xf32, #tpu.memory_space<smem>>
    %87 = vector.broadcast %86 : f32 to vector<2x128xf32>
    %88 = arith.mulf %3, %87 : vector<2x128xf32>
    %89 = arith.addf %85, %88 : vector<2x128xf32>
    %c3_49 = arith.constant 3 : index
    %c2_50 = arith.constant 2 : index
    %90 = memref.load %arg3[%c3_49, %c2_50] : memref<4x4xf32, #tpu.memory_space<smem>>
    %91 = vector.broadcast %90 : f32 to vector<2x128xf32>
    %92 = arith.mulf %5, %91 : vector<2x128xf32>
    %93 = arith.addf %89, %92 : vector<2x128xf32>
    %c3_51 = arith.constant 3 : index
    %c3_52 = arith.constant 3 : index
    %94 = memref.load %arg3[%c3_51, %c3_52] : memref<4x4xf32, #tpu.memory_space<smem>>
    %95 = vector.broadcast %94 : f32 to vector<2x128xf32>
    %96 = arith.mulf %7, %95 : vector<2x128xf32>
    %97 = arith.addf %93, %96 : vector<2x128xf32>
    %cst_53 = arith.constant 0.000000e+00 : f32
    %98 = vector.broadcast %cst_53 : f32 to vector<2x128xf32>
    %99 = arith.subf %98, %97 : vector<2x128xf32>
    %100 = math.exp %99 : vector<2x128xf32>
    %cst_54 = arith.constant 1.000000e+00 : f32
    %101 = vector.broadcast %cst_54 : f32 to vector<2x128xf32>
    %102 = arith.addf %101, %100 : vector<2x128xf32>
    %103 = tpu.reciprocal %102 : vector<2x128xf32> -> vector<2x128xf32>
    %c0_55 = arith.constant 0 : index
    %c0_56 = arith.constant 0 : index
    %104 = memref.load %arg5[%c0_55, %c0_56] : memref<4x4xf32, #tpu.memory_space<smem>>
    %105 = vector.broadcast %104 : f32 to vector<2x128xf32>
    %106 = arith.mulf %31, %105 : vector<2x128xf32>
    %c0_57 = arith.constant 0 : index
    %107 = memref.load %arg6[%c0_57] : memref<4xf32, #tpu.memory_space<smem>>
    %108 = vector.broadcast %107 : f32 to vector<2x128xf32>
    %109 = arith.addf %106, %108 : vector<2x128xf32>
    %c0_58 = arith.constant 0 : index
    %c1_59 = arith.constant 1 : index
    %110 = memref.load %arg5[%c0_58, %c1_59] : memref<4x4xf32, #tpu.memory_space<smem>>
    %111 = vector.broadcast %110 : f32 to vector<2x128xf32>
    %112 = arith.mulf %55, %111 : vector<2x128xf32>
    %113 = arith.addf %109, %112 : vector<2x128xf32>
    %c0_60 = arith.constant 0 : index
    %c2_61 = arith.constant 2 : index
    %114 = memref.load %arg5[%c0_60, %c2_61] : memref<4x4xf32, #tpu.memory_space<smem>>
    %115 = vector.broadcast %114 : f32 to vector<2x128xf32>
    %116 = arith.mulf %79, %115 : vector<2x128xf32>
    %117 = arith.addf %113, %116 : vector<2x128xf32>
    %c0_62 = arith.constant 0 : index
    %c3_63 = arith.constant 3 : index
    %118 = memref.load %arg5[%c0_62, %c3_63] : memref<4x4xf32, #tpu.memory_space<smem>>
    %119 = vector.broadcast %118 : f32 to vector<2x128xf32>
    %120 = arith.mulf %103, %119 : vector<2x128xf32>
    %121 = arith.addf %117, %120 : vector<2x128xf32>
    %cst_64 = arith.constant 0.000000e+00 : f32
    %122 = vector.broadcast %cst_64 : f32 to vector<2x128xf32>
    %123 = arith.subf %122, %121 : vector<2x128xf32>
    %124 = math.exp %123 : vector<2x128xf32>
    %cst_65 = arith.constant 1.000000e+00 : f32
    %125 = vector.broadcast %cst_65 : f32 to vector<2x128xf32>
    %126 = arith.addf %125, %124 : vector<2x128xf32>
    %127 = tpu.reciprocal %126 : vector<2x128xf32> -> vector<2x128xf32>
    %c1_66 = arith.constant 1 : index
    %c0_67 = arith.constant 0 : index
    %128 = memref.load %arg5[%c1_66, %c0_67] : memref<4x4xf32, #tpu.memory_space<smem>>
    %129 = vector.broadcast %128 : f32 to vector<2x128xf32>
    %130 = arith.mulf %31, %129 : vector<2x128xf32>
    %c1_68 = arith.constant 1 : index
    %131 = memref.load %arg6[%c1_68] : memref<4xf32, #tpu.memory_space<smem>>
    %132 = vector.broadcast %131 : f32 to vector<2x128xf32>
    %133 = arith.addf %130, %132 : vector<2x128xf32>
    %c1_69 = arith.constant 1 : index
    %c1_70 = arith.constant 1 : index
    %134 = memref.load %arg5[%c1_69, %c1_70] : memref<4x4xf32, #tpu.memory_space<smem>>
    %135 = vector.broadcast %134 : f32 to vector<2x128xf32>
    %136 = arith.mulf %55, %135 : vector<2x128xf32>
    %137 = arith.addf %133, %136 : vector<2x128xf32>
    %c1_71 = arith.constant 1 : index
    %c2_72 = arith.constant 2 : index
    %138 = memref.load %arg5[%c1_71, %c2_72] : memref<4x4xf32, #tpu.memory_space<smem>>
    %139 = vector.broadcast %138 : f32 to vector<2x128xf32>
    %140 = arith.mulf %79, %139 : vector<2x128xf32>
    %141 = arith.addf %137, %140 : vector<2x128xf32>
    %c1_73 = arith.constant 1 : index
    %c3_74 = arith.constant 3 : index
    %142 = memref.load %arg5[%c1_73, %c3_74] : memref<4x4xf32, #tpu.memory_space<smem>>
    %143 = vector.broadcast %142 : f32 to vector<2x128xf32>
    %144 = arith.mulf %103, %143 : vector<2x128xf32>
    %145 = arith.addf %141, %144 : vector<2x128xf32>
    %cst_75 = arith.constant 0.000000e+00 : f32
    %146 = vector.broadcast %cst_75 : f32 to vector<2x128xf32>
    %147 = arith.subf %146, %145 : vector<2x128xf32>
    %148 = math.exp %147 : vector<2x128xf32>
    %cst_76 = arith.constant 1.000000e+00 : f32
    %149 = vector.broadcast %cst_76 : f32 to vector<2x128xf32>
    %150 = arith.addf %149, %148 : vector<2x128xf32>
    %151 = tpu.reciprocal %150 : vector<2x128xf32> -> vector<2x128xf32>
    %c2_77 = arith.constant 2 : index
    %c0_78 = arith.constant 0 : index
    %152 = memref.load %arg5[%c2_77, %c0_78] : memref<4x4xf32, #tpu.memory_space<smem>>
    %153 = vector.broadcast %152 : f32 to vector<2x128xf32>
    %154 = arith.mulf %31, %153 : vector<2x128xf32>
    %c2_79 = arith.constant 2 : index
    %155 = memref.load %arg6[%c2_79] : memref<4xf32, #tpu.memory_space<smem>>
    %156 = vector.broadcast %155 : f32 to vector<2x128xf32>
    %157 = arith.addf %154, %156 : vector<2x128xf32>
    %c2_80 = arith.constant 2 : index
    %c1_81 = arith.constant 1 : index
    %158 = memref.load %arg5[%c2_80, %c1_81] : memref<4x4xf32, #tpu.memory_space<smem>>
    %159 = vector.broadcast %158 : f32 to vector<2x128xf32>
    %160 = arith.mulf %55, %159 : vector<2x128xf32>
    %161 = arith.addf %157, %160 : vector<2x128xf32>
    %c2_82 = arith.constant 2 : index
    %c2_83 = arith.constant 2 : index
    %162 = memref.load %arg5[%c2_82, %c2_83] : memref<4x4xf32, #tpu.memory_space<smem>>
    %163 = vector.broadcast %162 : f32 to vector<2x128xf32>
    %164 = arith.mulf %79, %163 : vector<2x128xf32>
    %165 = arith.addf %161, %164 : vector<2x128xf32>
    %c2_84 = arith.constant 2 : index
    %c3_85 = arith.constant 3 : index
    %166 = memref.load %arg5[%c2_84, %c3_85] : memref<4x4xf32, #tpu.memory_space<smem>>
    %167 = vector.broadcast %166 : f32 to vector<2x128xf32>
    %168 = arith.mulf %103, %167 : vector<2x128xf32>
    %169 = arith.addf %165, %168 : vector<2x128xf32>
    %cst_86 = arith.constant 0.000000e+00 : f32
    %170 = vector.broadcast %cst_86 : f32 to vector<2x128xf32>
    %171 = arith.subf %170, %169 : vector<2x128xf32>
    %172 = math.exp %171 : vector<2x128xf32>
    %cst_87 = arith.constant 1.000000e+00 : f32
    %173 = vector.broadcast %cst_87 : f32 to vector<2x128xf32>
    %174 = arith.addf %173, %172 : vector<2x128xf32>
    %175 = tpu.reciprocal %174 : vector<2x128xf32> -> vector<2x128xf32>
    %c3_88 = arith.constant 3 : index
    %c0_89 = arith.constant 0 : index
    %176 = memref.load %arg5[%c3_88, %c0_89] : memref<4x4xf32, #tpu.memory_space<smem>>
    %177 = vector.broadcast %176 : f32 to vector<2x128xf32>
    %178 = arith.mulf %31, %177 : vector<2x128xf32>
    %c3_90 = arith.constant 3 : index
    %179 = memref.load %arg6[%c3_90] : memref<4xf32, #tpu.memory_space<smem>>
    %180 = vector.broadcast %179 : f32 to vector<2x128xf32>
    %181 = arith.addf %178, %180 : vector<2x128xf32>
    %c3_91 = arith.constant 3 : index
    %c1_92 = arith.constant 1 : index
    %182 = memref.load %arg5[%c3_91, %c1_92] : memref<4x4xf32, #tpu.memory_space<smem>>
    %183 = vector.broadcast %182 : f32 to vector<2x128xf32>
    %184 = arith.mulf %55, %183 : vector<2x128xf32>
    %185 = arith.addf %181, %184 : vector<2x128xf32>
    %c3_93 = arith.constant 3 : index
    %c2_94 = arith.constant 2 : index
    %186 = memref.load %arg5[%c3_93, %c2_94] : memref<4x4xf32, #tpu.memory_space<smem>>
    %187 = vector.broadcast %186 : f32 to vector<2x128xf32>
    %188 = arith.mulf %79, %187 : vector<2x128xf32>
    %189 = arith.addf %185, %188 : vector<2x128xf32>
    %c3_95 = arith.constant 3 : index
    %c3_96 = arith.constant 3 : index
    %190 = memref.load %arg5[%c3_95, %c3_96] : memref<4x4xf32, #tpu.memory_space<smem>>
    %191 = vector.broadcast %190 : f32 to vector<2x128xf32>
    %192 = arith.mulf %103, %191 : vector<2x128xf32>
    %193 = arith.addf %189, %192 : vector<2x128xf32>
    %cst_97 = arith.constant 0.000000e+00 : f32
    %194 = vector.broadcast %cst_97 : f32 to vector<2x128xf32>
    %195 = arith.subf %194, %193 : vector<2x128xf32>
    %196 = math.exp %195 : vector<2x128xf32>
    %cst_98 = arith.constant 1.000000e+00 : f32
    %197 = vector.broadcast %cst_98 : f32 to vector<2x128xf32>
    %198 = arith.addf %197, %196 : vector<2x128xf32>
    %199 = tpu.reciprocal %198 : vector<2x128xf32> -> vector<2x128xf32>
    %c0_99 = arith.constant 0 : index
    %c0_100 = arith.constant 0 : index
    %c0_101 = arith.constant 0 : index
    %c0_102 = arith.constant 0 : index
    %200 = vector.load %arg7[%c0_99, %c0_100, %c0_101, %c0_102] : memref<1x4x2x128xf32, #tpu.memory_space<vmem>>, vector<1x1x2x128xf32>
    %201 = vector.shape_cast %200 : vector<1x1x2x128xf32> to vector<2x128xf32>
    %202 = vector.shape_cast %127 : vector<2x128xf32> to vector<1x1x2x128xf32>
    tpu.vector_store %arg7[%c0_99, %c0_100, %c0_101, %c0_102], %202 {strides = array<i32>} : memref<1x4x2x128xf32, #tpu.memory_space<vmem>>, vector<1x1x2x128xf32>,
    %c0_103 = arith.constant 0 : index
    %c1_104 = arith.constant 1 : index
    %c0_105 = arith.constant 0 : index
    %c0_106 = arith.constant 0 : index
    %203 = vector.load %arg7[%c0_103, %c1_104, %c0_105, %c0_106] : memref<1x4x2x128xf32, #tpu.memory_space<vmem>>, vector<1x1x2x128xf32>
    %204 = vector.shape_cast %203 : vector<1x1x2x128xf32> to vector<2x128xf32>
    %205 = vector.shape_cast %151 : vector<2x128xf32> to vector<1x1x2x128xf32>
    tpu.vector_store %arg7[%c0_103, %c1_104, %c0_105, %c0_106], %205 {strides = array<i32>} : memref<1x4x2x128xf32, #tpu.memory_space<vmem>>, vector<1x1x2x128xf32>,
    %c0_107 = arith.constant 0 : index
    %c2_108 = arith.constant 2 : index
    %c0_109 = arith.constant 0 : index
    %c0_110 = arith.constant 0 : index
    %206 = vector.load %arg7[%c0_107, %c2_108, %c0_109, %c0_110] : memref<1x4x2x128xf32, #tpu.memory_space<vmem>>, vector<1x1x2x128xf32>
    %207 = vector.shape_cast %206 : vector<1x1x2x128xf32> to vector<2x128xf32>
    %208 = vector.shape_cast %175 : vector<2x128xf32> to vector<1x1x2x128xf32>
    tpu.vector_store %arg7[%c0_107, %c2_108, %c0_109, %c0_110], %208 {strides = array<i32>} : memref<1x4x2x128xf32, #tpu.memory_space<vmem>>, vector<1x1x2x128xf32>,
    %c0_111 = arith.constant 0 : index
    %c3_112 = arith.constant 3 : index
    %c0_113 = arith.constant 0 : index
    %c0_114 = arith.constant 0 : index
    %209 = vector.load %arg7[%c0_111, %c3_112, %c0_113, %c0_114] : memref<1x4x2x128xf32, #tpu.memory_space<vmem>>, vector<1x1x2x128xf32>
    %210 = vector.shape_cast %209 : vector<1x1x2x128xf32> to vector<2x128xf32>
    %211 = vector.shape_cast %199 : vector<2x128xf32> to vector<1x1x2x128xf32>
    tpu.vector_store %arg7[%c0_111, %c3_112, %c0_113, %c0_114], %211 {strides = array<i32>} : memref<1x4x2x128xf32, #tpu.memory_space<vmem>>, vector<1x1x2x128xf32>,
    return
  }
  func.func @transform_0(%arg0: i32, %arg1: i32) -> (i32, i32, i32, i32) {
    %c0_i32 = arith.constant 0 : i32
    %c0_i32_0 = arith.constant 0 : i32
    %c0_i32_1 = arith.constant 0 : i32
    return %arg0, %c0_i32, %arg1, %c0_i32_0 : i32, i32, i32, i32
  }
  func.func @transform_1(%arg0: i32, %arg1: i32) -> (i32, i32) {
    %c0_i32 = arith.constant 0 : i32
    %c0_i32_0 = arith.constant 0 : i32
    %c0_i32_1 = arith.constant 0 : i32
    return %c0_i32, %c0_i32_0 : i32, i32
  }
  func.func @transform_2(%arg0: i32, %arg1: i32) -> i32 {
    %c0_i32 = arith.constant 0 : i32
    %c0_i32_0 = arith.constant 0 : i32
    return %c0_i32 : i32
  }
  func.func @transform_3(%arg0: i32, %arg1: i32) -> (i32, i32) {
    %c0_i32 = arith.constant 0 : i32
    %c0_i32_0 = arith.constant 0 : i32
    %c0_i32_1 = arith.constant 0 : i32
    return %c0_i32, %c0_i32_0 : i32, i32
  }
  func.func @transform_4(%arg0: i32, %arg1: i32) -> i32 {
    %c0_i32 = arith.constant 0 : i32
    %c0_i32_0 = arith.constant 0 : i32
    return %c0_i32 : i32
  }
  func.func @transform_5(%arg0: i32, %arg1: i32) -> (i32, i32, i32, i32) {
    %c0_i32 = arith.constant 0 : i32
    %c0_i32_0 = arith.constant 0 : i32
    %c0_i32_1 = arith.constant 0 : i32
    return %arg0, %c0_i32, %arg1, %c0_i32_0 : i32, i32, i32, i32
  }
}

</mosaic_0001>

<bundles_post_ra>
// kernel: tpu_custom_call.1
= control target key start
LH: loop header
LB: loop body
LE: loop exit
PB: predicated region body
PF: predicated region fallthrough
CT: control target
= control target key end

     0   :  { %s1448_s0 = inlined_call_operand.hbm [shape: f32[2,4,2,128], index: 0, kind: input, shape index: {}]   ;;  %s1449_s1 = inlined_call_operand.hbm [shape: f32[4,4], index: 1, kind: input, shape index: {}]   ;;  %s1450_s2 = inlined_call_operand.vmem [shape: f32[4], index: 2, kind: input, shape index: {}]   ;;  %s1451_s3 = inlined_call_operand.vmem [shape: f32[4,4], index: 3, kind: input, shape index: {}]   ;;  %s1452_s4 = inlined_call_operand.vmem [shape: f32[4], index: 4, kind: input, shape index: {}]   ;;  %s1453_s5 = inlined_call_operand.hbm [shape: f32[2,4,2,128], index: 5, kind: output, shape index: {}]  }
   0x1   :  { %1460 = sst [smem:[#allocation19_spill]] %s1448_s0 }
   0x2   :  { %1461 = sst [smem:[#allocation20_spill]] %s1449_s1 }
   0x3   :  { %1462 = sst [smem:[#allocation21_spill]] %s1450_s2 }
   0x4   :  { %1463 = sst [smem:[#allocation22_spill]] %s1451_s3 }
   0x5   :  { %1464 = sst [smem:[#allocation23_spill]] %s1452_s4 }
   0x6   :  { %10 = vsyncpa [#allocation3], 0 }
   0x7   :  { %12 = vsyncpa [#allocation3 + $0x1], 0 }
   0x8   :  { %13 = vsyncpa [#allocation5], 0 }
   0x9   :  { %14 = vsyncpa [#allocation6], 0 }
   0xa   :  { %15 = vsyncpa [#allocation10], 0 }
   0xb   :  { %16 = vsyncpa [#allocation4], 0 }
   0xc   :  { %18 = vsyncpa [#allocation4 + $0x1], 0  ;;  %s1081_s18 = smov 0   ;;  %s1083_s19 = smov 0  }
   0xd   :  { %s1085_s20 = smov 0   ;;  %s1087_s21 = smov 0  }
   0xe   :  { %s1089_s22 = smov 0   ;;  %s1091_s23 = smov 0  }
   0xf LB: > { %s651_s24 = sadd.s32 4294967295, %s1039_s23   ;;  %s652_s25 = sadd.s32 4294967294, %s1039_s23   ;;  %s1039_s23 = sphi %s1091_s23, %s24_s23   ;;  %s1035_s22 = sphi %s1089_s22, %s1490_s22   ;;  %s1031_s21 = sphi %s1087_s21, %s1489_s21   ;;  %s1027_s20 = sphi %s1085_s20, %s1488_s20   ;;  %s1023_s19 = sphi %s1083_s19, %s1487_s19   ;;  %s1019_s18 = sphi %s1081_s18, %s1486_s18  }
  0x10   : > { %p58_p0 = scmp.ne.s32.totalorder %s1023_s19, %s1019_s18  ;;  %p1115_p1 = scmp.eq.s32.totalorder %s651_s24, 0 }
  0x11   : > { %p1119_p2 = scmp.eq.s32.totalorder %s651_s24, 1  ;;  %p174_p3 = scmp.eq.s32.totalorder %s652_s25, 1 }
  0x12   : > { %s1465_s26 = scalar_select %p1115_p1, 1, 0 }
  0x13   : > { %p1125_p4 = por %p1115_p1, %p58_p0  ;;  %p653_p5 = scmp.ge.s32.totalorder %s1039_s23, 1 }
  0x14   : > { %p1130_p6 = por %p174_p3, %p58_p0  ;;  %p181_p7 = scmp.lt.s32.totalorder %s1039_s23, 3 }
  0x15   : > { %s1467_s28 = scalar_select %p1125_p4, 1, 0 }
  0x16   : > { %s1468_s29 = scalar_select %p1130_p6, 1, 0 }
  0x17   : > { %s1469_s3 = sld [smem:[#allocation22_spill]]  ;;  %p1138_p8 = pnand %p653_p5, %p181_p7 }
  0x18   : > { %s1472_s2 = sld [smem:[#allocation21_spill]]  ;;  %s1473_s4 = sld [smem:[#allocation23_spill]] }
  0x19   : > { %p738_p10 = pneg %p1138_p8 }
  0x1b   : > { %p1147_p11 = pnand %p738_p10, %p1115_p1 }
  0x1d   : > { %s214_s7 = sshll.u32 %s1469_s3, 4  ;;  %p859_p13 = pneg %p1147_p11  ;;  %s215_s7 = int_to_ptr.vmem [resolvable:$true] %s214_s7 }
  0x1e   : > { %s203_s12 = sshll.u32 %s1472_s2, 4  ;;  %s225_s15 = sshll.u32 %s1473_s4, 4  ;;  %s1154_s12 = int_to_ptr.vmem [resolvable:$true] %s203_s12  ;;  %s226_s15 = int_to_ptr.vmem [resolvable:$true] %s225_s15 }
  0x1f   : > { %s857_s16 = scalar_lea.vmem %s215_s7, 64  ;;  %p865_p5 = scmp.lt.s32.totalorder %s215_s7, %s215_s7 }
  0x20   : > { %p858_p12 = scmp.ne.s32.totalorder %s215_s7, %s857_s16  ;;  %p866_p7 = scmp.lt.s32.totalorder %s857_s16, %s857_s16 }
  0x22   : > { %p860_p0 = pnand %p859_p13, %p858_p12  ;;  %p867_p10 = por %p866_p7, %p865_p5 }
  0x24   : > { %p861_p3 = pneg %p860_p0 }
  0x26   : > { %p868_p9 = pnand %p867_p10, %p861_p3 }
  0x28   : > { %871 = shalt.err (!%p868_p9)
}
  0x29   : > { %s1041_s17 = smov [#allocation9]   ;;  %s1474_s1 = sld [smem:[#allocation20_spill]] }
  0x2a   : > { %747 = dma.vmem_to_smem (!%p1147_p11), %s215_s7, 64, %s1041_s17, [#allocation10]  }
  0x2f   : > { %s872_s30 = scalar_lea.hbm %s1474_s1, 64 }
  0x30   : > { %p873_p6 = scmp.ne.s32.totalorder %s1474_s1, %s872_s30  ;;  %p879_p9 = scmp.lt.u32.totalorder %s872_s30, %s1474_s1 }
  0x32   : > { %p875_p12 = pnand %p873_p6, %p859_p13 }
  0x34   : > { %p876_p0 = pneg %p875_p12 }
  0x36   : > { %p881_p3 = pnand %p879_p9, %p876_p0 }
  0x38   : > { %884 = shalt.err (!%p881_p3)
}
  0x39   : > { %s1042_s14 = smov [#allocation7]   ;;  %s885_s17 = scalar_lea.vmem %s1154_s12, 16 }
  0x3a   : > { %741 = dma.hbm_to_smem (!%p1147_p11), %s1474_s1, 64, %s1042_s14, [#allocation5]  }
  0x3b   : > { %p886_p6 = scmp.ne.s32.totalorder %s1154_s12, %s885_s17  ;;  %p893_p10 = scmp.lt.s32.totalorder %s1154_s12, %s1154_s12 }
  0x3c   : > { %p894_p12 = scmp.lt.s32.totalorder %s885_s17, %s885_s17 }
  0x3d   : > { %p888_p5 = pnand %p886_p6, %p859_p13 }
  0x3e   : > { %p895_p0 = por %p894_p12, %p893_p10 }
  0x3f   : > { %p889_p7 = pneg %p888_p5 }
  0x41   : > { %p896_p9 = pnand %p895_p0, %p889_p7 }
  0x43   : > { %899 = shalt.err (!%p896_p9)
}
  0x44   : > { %s1043_s24 = smov [#allocation8]   ;;  %s900_s6 = scalar_lea.vmem %s226_s15, 16 }
  0x45   : > { %744 = dma.vmem_to_smem (!%p1147_p11), %s1154_s12, 16, %s1043_s24, [#allocation6]  }
  0x46   : > { %p901_p3 = scmp.ne.s32.totalorder %s226_s15, %s900_s6  ;;  %p908_p10 = scmp.lt.s32.totalorder %s226_s15, %s226_s15 }
  0x47   : > { %p909_p7 = scmp.lt.s32.totalorder %s900_s6, %s900_s6 }
  0x48   : > { %p903_p6 = pnand %p901_p3, %p859_p13 }
  0x49   : > { %p910_p12 = por %p909_p7, %p908_p10 }
  0x4a   : > { %p904_p5 = pneg %p903_p6 }
  0x4c   : > { %p911_p0 = pnand %p910_p12, %p904_p5 }
  0x4e   : > { %914 = shalt.err (!%p911_p0)
}
  0x4f   : > { %s1044_s10 = smov [#allocation11]   ;;  %s36_s12 = sadd.s32 1, %s1035_s22 }
  0x50   : > { %750 = dma.vmem_to_smem (!%p1147_p11), %s226_s15, 16, %s1044_s10, [#allocation10]  }
  0x51   : > { %s45_s11 = sadd.s32 1, %s1027_s20  ;;  %p38_p13 = scmp.ge.s32.totalorder %s36_s12, 2 }
  0x52   : > { %p52_p9 = scmp.ne.s32.totalorder %s1027_s20, %s1023_s19  ;;  %p53_p3 = scmp.eq.s32.totalorder %s1039_s23, 0 }
  0x53   : > { %p763_p6 = scmp.lt.s32.totalorder %s1039_s23, 2  ;;  %s1492_s12 = smov (%p38_p13, %s36_s12), 0 }
  0x54   : > { %1475 = sst [smem:[#allocation18_spill]] %s1492_s12  ;;  %p54_p5 = por %p53_p3, %p52_p9 }
  0x55   : > { %p1212_p10 = por %p1119_p2, %p52_p9  ;;  %s40_s13 = ssub.s32 %s1035_s22, %s1492_s12 }
  0x56   : > { %s236_s14 = sand.u32 1, %s1027_s20   ;;  %p43_p7 = scmp.eq.s32.totalorder %s40_s13, 0 }
  0x57   : > { %s1476_s9 = scalar_select %p1212_p10, 1, 0 }
  0x58   : > { %s659_s15 = sshll.u32 %s236_s14, 3  ;;  %s716_s7 = sshll.u32 %s1035_s22, 7 }
  0x59   : > { %s1221_s16 = scalar_select %p43_p7, %s1027_s20, %s45_s11  }
  0x5a   : > { %s1477_s0 = sld [smem:[#allocation19_spill]]  ;;  %s240_s27 = scalar_lea.vmem [#allocation2], %s659_s15 }
  0x5b   : > { %s248_s30 = sshll.u32 %s240_s27, 4  ;;  %p1230_p2 = pnand %p763_p6, %p54_p5  ;;  %s1234_s30 = int_to_ptr.vmem [resolvable:$true] %s248_s30 }
  0x5c   : > { %s1236_s10 = scalar_lea.sflag [#allocation3], %s236_s14 }
  0x5d   : > { %p917_p12 = pneg %p1230_p2 }
  0x60   : > { %s1226_s25 = scalar_lea.hbm %s1477_s0, %s716_s7  ;;  %s920_s7 = scalar_lea.hbm %s1477_s0, 256 }
  0x61   : > { %s915_s11 = scalar_lea.hbm %s1226_s25, 128  ;;  %p921_p9 = scmp.lt.u32.totalorder %s1226_s25, %s1477_s0 }
  0x62   : > { %p916_p11 = scmp.ne.s32.totalorder %s1226_s25, %s915_s11  ;;  %p922_p3 = scmp.lt.u32.totalorder %s920_s7, %s915_s11 }
  0x63   : > { %p924_p5 = scmp.lt.u32.totalorder %s915_s11, %s1226_s25 }
  0x64   : > { %p918_p0 = pnand %p917_p12, %p916_p11  ;;  %p923_p6 = por %p922_p3, %p921_p9 }
  0x66   : > { %p919_p13 = pneg %p918_p0  ;;  %p925_p7 = por %p924_p5, %p923_p6 }
  0x68   : > { %p926_p10 = pnand %p925_p7, %p919_p13 }
  0x6a   : > { %929 = shalt.err (!%p926_p10)
}
  0x6b   : > { %s930_s14 = scalar_lea.vmem %s1234_s30, 128  ;;  %s1045_s27 = smov [#allocation2]  }
  0x6c   : > { %p931_p11 = scmp.ne.s32.totalorder %s1234_s30, %s930_s14  ;;  %s935_s13 = sshll.u32 %s1045_s27, 4  ;;  %s936_s13 = int_to_ptr.vmem [resolvable:$false] %s935_s13 }
  0x6d   : > { %s937_s15 = scalar_lea.vmem %s936_s13, 256  ;;  %p938_p4 = scmp.lt.s32.totalorder %s1234_s30, %s936_s13 }
  0x6e   : > { %p933_p0 = pnand %p931_p11, %p917_p12  ;;  %p939_p9 = scmp.lt.s32.totalorder %s937_s15, %s930_s14 }
  0x70   : > { %p934_p1 = pneg %p933_p0  ;;  %p940_p3 = por %p939_p9, %p938_p4 }
  0x72   : > { %p941_p6 = pnand %p940_p3, %p934_p1 }
  0x74   : > { %944 = shalt.err (!%p941_p6)
}
  0x75   : > { %s1046_s11 = smov 32   ;;  %s1047_s7 = smov 2  }
  0x76   : > { %754 = dma.hbm_to_vmem [thread:$0]  (!%p1230_p2), %s1226_s25, 128, %s1234_s30, %s1236_s10, %s1046_s11, %s1046_s11, %s1047_s7  }
  0x77   : > { %260 = sbr.rel (%p1138_p8) target bundleno = 240 (0xf0), region = 40  ;;  %s1267_s17 = sand.u32 (!%p1138_p8), 1, %s1023_s19  }
  0x78   : > { %s1458_s24 = sshll.u32 (!%p1138_p8), %s1267_s17, 3  ;;  %s263_s14 = scalar_lea.sflag (!%p1138_p8), [#allocation3], %s1267_s17 }
  0x79   : > { %s266_s27 = scalar_lea.vmem (!%p1138_p8), [#allocation2], %s1458_s24  ;;  %p1479_p1 = scmp.ne.s32.totalorder (!%p1138_p8), %s1467_s28, 0 }
  0x7e   : > { %998 = dma.done.wait (%p1479_p1), %s263_s14, 128  }
  0x7f   : > { %1000 = vsyncadd (%p1479_p1), %s263_s14, 4294967168  ;;  %p1480_p4 = scmp.ne.s32.totalorder %s1465_s26, 0 }
  0x81   : > { %1002 = dma.done.wait (%p1480_p4), [#allocation5], 64  }
  0x82   : > { %1004 = vsyncadd (%p1480_p4), [#allocation5], 4294967232 }
  0x83   : > { %1006 = dma.done.wait (%p1480_p4), [#allocation6], 16  }
  0x84   : > { %1008 = vsyncadd (%p1480_p4), [#allocation6], 4294967280 }
  0x85   : > { %1010 = dma.done.wait (%p1480_p4), [#allocation10], 80  }
  0x86   : > { %1012 = vsyncadd (%p1480_p4), [#allocation10], 4294967216 }
  0x87   : > { %287 = sfence }
  0x88   : > { %s317_s28 = sld [smem:[#allocation7]]  ;;  %s672_s25 = sld [smem:[#allocation7 + $0x1]]  ;;  %v310_v0 = vld [vmem:[%s266_s27] sm:$0x3]  ;;  %v669_v1 = vld [vmem:[%s266_s27 + $0x2] sm:$0x3] }
  0x89   : > { %s320_s8 = sld [smem:[#allocation8]]  ;;  %s673_s30 = sld [smem:[#allocation7 + $0x2]]  ;;  %v670_v2 = vld [vmem:[%s266_s27 + $0x4] sm:$0x3]  ;;  %v671_v3 = vld [vmem:[%s266_s27 + $0x6] sm:$0x3] }
  0x8a   : > { %s674_s6 = sld [smem:[#allocation7 + $0x3]]  ;;  %s675_s10 = sld [smem:[#allocation7 + $0x80]] }
  0x8b   : > { %s1289_s13 = sld [smem:[#allocation8 + $0x1]]  ;;  %s1293_s11 = sld [smem:[#allocation7 + $0x82]] }
  0x8c   : > { %s1291_s15 = sld [smem:[#allocation7 + $0x81]]  ;;  %s1295_s7 = sld [smem:[#allocation7 + $0x83]] }
  0x8d   : > { %s1297_s26 = sld [smem:[#allocation7 + $0x100]]  ;;  %s1299_s14 = sld [smem:[#allocation8 + $0x2]] }
  0x8e   : > { %v318_v4 = vstv %s317_s28  ;;  %s1301_s24 = sld [smem:[#allocation7 + $0x101]]  ;;  %v324_v7 = vstv %s672_s25  ;;  %s1303_s0 = sld [smem:[#allocation7 + $0x102]] }
  0x8f   : > { %v319_v5 = vmul.f32 %v318_v4, %v310_v0  ;;  %v321_v6 = vstv %s320_s8  ;;  %s1305_s1 = sld [smem:[#allocation7 + $0x103]]  ;;  %v325_v8 = vmul.f32 %v669_v1, %v324_v7  ;;  %v328_v9 = vstv %s673_s30  ;;  %s1307_s2 = sld [smem:[#allocation7 + $0x180]] }
  0x90   : > { %v332_v10 = vstv %s674_s6  ;;  %s1309_s27 = sld [smem:[#allocation8 + $0x3]]  ;;  %v329_v12 = vmul.f32 %v670_v2, %v328_v9  ;;  %v341_v14 = vstv %s675_s10  ;;  %s1311_s28 = sld [smem:[#allocation7 + $0x181]] }
  0x91   : > { %v322_v11 = vadd.f32 %v321_v6, %v319_v5  ;;  %v333_v13 = vmul.f32 %v671_v3, %v332_v10  ;;  %s1313_s8 = sld [smem:[#allocation7 + $0x182]]  ;;  %v342_v15 = vmul.f32 %v341_v14, %v310_v0  ;;  %v344_v16 = vstv %s1289_s13  ;;  %s1318_s25 = sld [smem:[#allocation7 + $0x183]] }
  0x92   : > { %v347_v17 = vstv %s1291_s15  ;;  %v351_v18 = vstv %s1293_s11  ;;  %v355_v22 = vstv %s1295_s7  ;;  %s1339_s30 = sld [smem:[#allocation11 + $0x1]]  ;;  %s1343_s10 = sld [smem:[#allocation9 + $0x100]] }
  0x93   : > { %v326_v19 = vadd.f32 %v325_v8, %v322_v11  ;;  %v348_v20 = vmul.f32 %v669_v1, %v347_v17  ;;  %v352_v21 = vmul.f32 %v670_v2, %v351_v18  ;;  %v345_v23 = vadd.f32 %v344_v16, %v342_v15  ;;  %s1341_s6 = sld [smem:[#allocation9 + $0x81]]  ;;  %s1345_s13 = sld [smem:[#allocation9 + $0x180]] }
  0x94   : > { %v356_v24 = vmul.f32 %v671_v3, %v355_v22  ;;  %v364_v25 = vstv %s1297_s26  ;;  %v367_v26 = vstv %s1299_s14  ;;  %v370_v29 = vstv %s1301_s24  ;;  %s1337_s24 = sld [smem:[#allocation9 + $0x80]]  ;;  %s1347_s15 = sld [smem:[#allocation11 + $0x2]] }
  0x95   : > { %v330_v27 = vadd.f32 %v329_v12, %v326_v19  ;;  %v365_v28 = vmul.f32 %v364_v25, %v310_v0  ;;  %v374_v30 = vstv %s1303_s0  ;;  %v349_v31 = vadd.f32 %v348_v20, %v345_v23  ;;  %s1331_s0 = sld [smem:[#allocation9]]  ;;  %s1349_s11 = sld [smem:[#allocation9 + $0x101]] }
  0x96   : > { %v371_v32 = vmul.f32 %v669_v1, %v370_v29  ;;  %v375_v33 = vmul.f32 %v670_v2, %v374_v30  ;;  %v378_v34 = vstv %s1305_s1  ;;  %v387_v38 = vstv %s1307_s2  ;;  %s1333_s1 = sld [smem:[#allocation11]]  ;;  %s1335_s2 = sld [smem:[#allocation9 + $0x1]] }
  0x97   : > { %v334_v35 = vadd.f32 %v333_v13, %v330_v27  ;;  %v368_v36 = vadd.f32 %v367_v26, %v365_v28  ;;  %v379_v37 = vmul.f32 %v671_v3, %v378_v34  ;;  %v353_v39 = vadd.f32 %v352_v21, %v349_v31  ;;  %s1351_s7 = sld [smem:[#allocation11 + $0x3]]  ;;  %s1353_s26 = sld [smem:[#allocation9 + $0x181]] }
  0x98   : > { %v388_v40 = vmul.f32 %v387_v38, %v310_v0  ;;  %v390_v41 = vstv %s1309_s27  ;;  %v393_v42 = vstv %s1311_s28  ;;  %v397_v46 = vstv %s1313_s8  ;;  %s1355_s14 = sld [smem:[#allocation9 + $0x2]]  ;;  %s1365_s3 = sld [smem:[#allocation9 + $0x83]] }
  0x99   : > { %v335_v43 = vsub.f32 0.0, %v334_v35  ;;  %v372_v44 = vadd.f32 %v371_v32, %v368_v36  ;;  %v394_v45 = vmul.f32 %v669_v1, %v393_v42  ;;  %v357_v47 = vadd.f32 %v356_v24, %v353_v39  ;;  %s1357_s27 = sld [smem:[#allocation9 + $0x82]]  ;;  %s1368_s4 = sld [smem:[#allocation9 + $0x103]] }
  0x9a   : > { %v391_v48 = vadd.f32 %v390_v41, %v388_v40  ;;  %v398_v49 = vmul.f32 %v670_v2, %v397_v46  ;;  %v401_v50 = vstv %s1318_s25  ;;  %s1359_s28 = sld [smem:[#allocation9 + $0x102]]  ;;  %s1363_s25 = sld [smem:[#allocation9 + $0x3]]  ;;  %v433_v10 = vstv %s1337_s24 }
  0x9b   : > { %v336_v51 = vmul.f32 1.442695, %v335_v43  ;;  %v376_v52 = vadd.f32 %v375_v33, %v372_v44  ;;  %v358_v53 = vsub.f32 0.0, %v357_v47  ;;  %v402_v55 = vmul.f32 %v671_v3, %v401_v50  ;;  %s1361_s8 = sld [smem:[#allocation9 + $0x182]]  ;;  %s1370_s12 = sld [smem:[#allocation9 + $0x183]] }
  0x9c   : > { %v395_v54 = vadd.f32 %v394_v45, %v391_v48  ;;  %v410_v8 = vstv %s1331_s0  ;;  %v413_v9 = vstv %s1333_s1  ;;  %v456_v11 = vstv %s1343_s10  ;;  %s717_s0 = sshll.u32 %s1031_s21, 7  ;;  %p1482_p10 = scmp.ne.s32.totalorder %s1476_s9, 0 }
  0x9d   : > { %825 = vpow2.f32 %v336_v51  ;;  %v380_v56 = vadd.f32 %v379_v37, %v376_v52  ;;  %v359_v57 = vmul.f32 1.442695, %v358_v53  ;;  %v479_v12 = vstv %s1345_s13  ;;  %s1399_s24 = scalar_lea.hbm %s1453_s5, %s717_s0 }
  0x9e   : > { %v399_v58 = vadd.f32 %v398_v49, %v395_v54  ;;  %v416_v13 = vstv %s1335_s2  ;;  %v436_v14 = vstv %s1339_s30  ;;  %v439_v15 = vstv %s1341_s6  ;;  %s509_s30 = scalar_lea.sflag [#allocation4], %s1267_s17  ;;  %s1048_s6 = smov [#allocation12]  }
  0x9f   : > { %v381_v59 = vsub.f32 0.0, %v380_v56  ;;  %827 = vpow2.f32 %v359_v57  ;;  %v459_v17 = vstv %s1347_s15  ;;  %v462_v18 = vstv %s1349_s11  ;;  %s949_s10 = sshll.u32 %s1048_s6, 4  ;;  %s950_s10 = int_to_ptr.vmem [resolvable:$false] %s949_s10 }
  0xa0   : > { %v403_v60 = vadd.f32 %v402_v55, %v399_v58  ;;  %v482_v19 = vstv %s1351_s7  ;;  %v485_v20 = vstv %s1353_s26  ;;  %v420_v25 = vstv %s1355_s14  ;;  %s951_s13 = scalar_lea.vmem %s950_s10, 256 }
  0xa1   : > { %v382_v61 = vmul.f32 1.442695, %v381_v59  ;;  %v443_v26 = vstv %s1357_s27  ;;  %v466_v27 = vstv %s1359_s28  ;;  %v489_v28 = vstv %s1361_s8 }
  0xa2   : > { %v404_v62 = vsub.f32 0.0, %v403_v60  ;;  %v424_v38 = vstv %s1363_s25  ;;  %v447_v39 = vstv %s1365_s3  ;;  %v470_v40 = vstv %s1368_s4  ;;  %s1481_s3 = sshll.u32 %s1267_s17, 3 }
  0xa3   : > { %829 = vpow2.f32 %v382_v61  ;;  %v493_v41 = vstv %s1370_s12  ;;  %s309_s4 = scalar_lea.vmem [#allocation12], %s1481_s3 }
  0xa4   : > { %v405_v63 = vmul.f32 1.442695, %v404_v62  ;;  %s523_s12 = sshll.u32 %s309_s4, 4  ;;  %s1394_s12 = int_to_ptr.vmem [resolvable:$true] %s523_s12 }
  0xa5   : > { %s945_s21 = scalar_lea.vmem %s1394_s12, 128  ;;  %p952_p13 = scmp.lt.s32.totalorder %s1394_s12, %s950_s10 }
  0xa6   : > { %831 = vpow2.f32 %v405_v63  ;;  %p946_p8 = scmp.ne.s32.totalorder %s1394_s12, %s945_s21  ;;  %p953_p5 = scmp.lt.s32.totalorder %s951_s13, %s945_s21 }
  0xa7   : > { %v826_v0 = vpop.eup %825 }
  0xa8   : > { %v338_v1 = vadd.f32 1.0, %v826_v0  ;;  %p947_p2 = pnand %p946_p8, %p1482_p10  ;;  %p954_p7 = por %p953_p5, %p952_p13 }
  0xa9   : > { %v828_v2 = vpop.eup %827 }
  0xaa   : > { %833 = vrcp.f32 %v338_v1  ;;  %v361_v3 = vadd.f32 1.0, %v828_v2  ;;  %p948_p12 = pneg %p947_p2 }
  0xac   : > { %835 = vrcp.f32 %v361_v3  ;;  %p955_p11 = pnand %p954_p7, %p948_p12 }
  0xad   : > { %v830_v4 = vpop.eup %829 }
  0xae   : > { %v384_v5 = vadd.f32 1.0, %v830_v4 }
  0xb0   : > { %v832_v6 = vpop.eup %831  ;;  %837 = vrcp.f32 %v384_v5 }
  0xb1   : > { %v407_v7 = vadd.f32 1.0, %v832_v6 }
  0xb3   : > { %839 = vrcp.f32 %v407_v7 }
  0xb4   : > { %v834_v16 = vpop.eup %833 }
  0xb5   : > { %v411_v21 = vmul.f32 %v834_v16, %v410_v8  ;;  %v434_v22 = vmul.f32 %v834_v16, %v433_v10  ;;  %v457_v23 = vmul.f32 %v834_v16, %v456_v11  ;;  %v480_v24 = vmul.f32 %v834_v16, %v479_v12 }
  0xb6   : > { %v836_v29 = vpop.eup %835 }
  0xb7   : > { %v414_v30 = vadd.f32 %v413_v9, %v411_v21  ;;  %v437_v31 = vadd.f32 %v436_v14, %v434_v22  ;;  %v460_v32 = vadd.f32 %v459_v17, %v457_v23  ;;  %v483_v33 = vadd.f32 %v482_v19, %v480_v24 }
  0xb8   : > { %v417_v34 = vmul.f32 %v836_v29, %v416_v13  ;;  %v440_v35 = vmul.f32 %v836_v29, %v439_v15  ;;  %v463_v36 = vmul.f32 %v836_v29, %v462_v18  ;;  %v486_v37 = vmul.f32 %v836_v29, %v485_v20 }
  0xba   : > { %v838_v42 = vpop.eup %837  ;;  %v418_v43 = vadd.f32 %v417_v34, %v414_v30  ;;  %v441_v44 = vadd.f32 %v440_v35, %v437_v31  ;;  %v464_v45 = vadd.f32 %v463_v36, %v460_v32  ;;  %v487_v46 = vadd.f32 %v486_v37, %v483_v33 }
  0xbb   : > { %v421_v47 = vmul.f32 %v838_v42, %v420_v25  ;;  %v444_v48 = vmul.f32 %v838_v42, %v443_v26  ;;  %v467_v49 = vmul.f32 %v838_v42, %v466_v27  ;;  %v490_v50 = vmul.f32 %v838_v42, %v489_v28 }
  0xbd   : > { %v840_v51 = vpop.eup %839  ;;  %v422_v52 = vadd.f32 %v421_v47, %v418_v43  ;;  %v445_v53 = vadd.f32 %v444_v48, %v441_v44  ;;  %v468_v54 = vadd.f32 %v467_v49, %v464_v45  ;;  %v491_v55 = vadd.f32 %v490_v50, %v487_v46 }
  0xbe   : > { %v425_v56 = vmul.f32 %v840_v51, %v424_v38  ;;  %v448_v57 = vmul.f32 %v840_v51, %v447_v39  ;;  %v471_v58 = vmul.f32 %v840_v51, %v470_v40  ;;  %v494_v59 = vmul.f32 %v840_v51, %v493_v41 }
  0xc0   : > { %v426_v60 = vadd.f32 %v425_v56, %v422_v52  ;;  %v449_v61 = vadd.f32 %v448_v57, %v445_v53  ;;  %v472_v62 = vadd.f32 %v471_v58, %v468_v54  ;;  %v495_v63 = vadd.f32 %v494_v59, %v491_v55 }
  0xc2   : > { %v427_v0 = vsub.f32 0.0, %v426_v60  ;;  %v450_v1 = vsub.f32 0.0, %v449_v61  ;;  %v473_v2 = vsub.f32 0.0, %v472_v62  ;;  %v496_v3 = vsub.f32 0.0, %v495_v63 }
  0xc4   : > { %v428_v4 = vmul.f32 1.442695, %v427_v0  ;;  %v451_v5 = vmul.f32 1.442695, %v450_v1  ;;  %v474_v6 = vmul.f32 1.442695, %v473_v2 }
  0xc5   : > { %v497_v7 = vmul.f32 1.442695, %v496_v3 }
  0xc6   : > { %841 = vpow2.f32 %v428_v4 }
  0xc7   : > { %843 = vpow2.f32 %v451_v5 }
  0xc8   : > { %845 = vpow2.f32 %v474_v6 }
  0xc9   : > { %847 = vpow2.f32 %v497_v7 }
  0xd0   : > { %v842_v8 = vpop.eup %841 }
  0xd1   : > { %v844_v9 = vpop.eup %843  ;;  %v430_v10 = vadd.f32 1.0, %v842_v8 }
  0xd2   : > { %v846_v11 = vpop.eup %845  ;;  %v453_v12 = vadd.f32 1.0, %v844_v9 }
  0xd3   : > { %v848_v13 = vpop.eup %847  ;;  %849 = vrcp.f32 %v430_v10  ;;  %v476_v14 = vadd.f32 1.0, %v846_v11 }
  0xd4   : > { %851 = vrcp.f32 %v453_v12  ;;  %v499_v15 = vadd.f32 1.0, %v848_v13 }
  0xd5   : > { %853 = vrcp.f32 %v476_v14 }
  0xd6   : > { %855 = vrcp.f32 %v499_v15 }
  0xdd   : > { %v850_v16 = vpop.eup %849 }
  0xde   : > { %v852_v17 = vpop.eup %851  ;;  %501 = vst [vmem:[%s309_s4] sm:$0x3] %v850_v16 }
  0xdf   : > { %v854_v18 = vpop.eup %853  ;;  %708 = vst [vmem:[%s309_s4 + $0x2] sm:$0x3] %v852_v17 }
  0xe0   : > { %v856_v19 = vpop.eup %855  ;;  %709 = vst [vmem:[%s309_s4 + $0x4] sm:$0x3] %v854_v18 }
  0xe1   : > { %710 = vst [vmem:[%s309_s4 + $0x6] sm:$0x3] %v856_v19 }
  0xe2   : > { %958 = shalt.err (!%p955_p11)
}
  0xe3   : > { %s959_s15 = scalar_lea.hbm %s1399_s24, 128  ;;  %s963_s26 = scalar_lea.hbm %s1453_s5, 256 }
  0xe4   : > { %p960_p0 = scmp.ne.s32.totalorder %s1399_s24, %s959_s15  ;;  %p964_p6 = scmp.lt.u32.totalorder %s1399_s24, %s1453_s5 }
  0xe5   : > { %p965_p1 = scmp.lt.u32.totalorder %s963_s26, %s959_s15  ;;  %p967_p8 = scmp.lt.u32.totalorder %s959_s15, %s1399_s24 }
  0xe6   : > { %p961_p9 = pnand %p960_p0, %p1482_p10 }
  0xe7   : > { %p966_p4 = por %p965_p1, %p964_p6 }
  0xe8   : > { %p962_p3 = pneg %p961_p9 }
  0xe9   : > { %p968_p2 = por %p967_p8, %p966_p4 }
  0xeb   : > { %p969_p12 = pnand %p968_p2, %p962_p3 }
  0xed   : > { %972 = shalt.err (!%p969_p12)
}
  0xee   : > { %s1049_s28 = smov 32   ;;  %s1050_s8 = smov 2  }
  0xef   : > { %736 = dma.vmem_to_hbm [thread:$0]  (%p1482_p10), %s1394_s12, 128, %s1399_s24, %s509_s30, %s1049_s28, %s1049_s28, %s1050_s8  }
  0xf0 PF: > { %s538_s25 = sand.u32 1, %s1019_s18   ;;  %p1483_p13 = scmp.ne.s32.totalorder %s1468_s29, 0 }
  0xf1   : > { %p1484_p5 = scmp.ge.s32.totalorder %s1039_s23, 2  ;;  %s539_s3 = scalar_lea.sflag [#allocation4], %s538_s25 }
  0xf3   : > { %p756_p7 = pnand %p1484_p5, %p1483_p13 }
  0xf5   : > { %1014 = dma.done.wait (!%p756_p7), %s539_s3, 128  }
  0xf6   : > { %1016 = vsyncadd (!%p756_p7), %s539_s3, 4294967168  ;;  %s24_s23 = sadd.s32 1, %s1039_s23   ;;  %s1485_s9 = sld [smem:[#allocation18_spill]] }
  0xf7   : > { %p21_p11 = scmp.ge.s32.totalorder %s24_s23, 4   ;;  %s1486_s18 = smov %s1023_s19 }
  0xf8   : > { %s1487_s19 = smov %s1027_s20  ;;  %s1488_s20 = smov %s1221_s16 }
  0xf9   : > { %s1489_s21 = smov %s1035_s22  ;;  %23 = sbr.rel (!%p21_p11) target bundleno = 15 (0xf), region = 109 }
  0xfc   : > { %s1490_s22 = smov %s1485_s9 }
 0x100   :  { %544 = vsyncpa [#allocation3], 1 }
 0x101   :  { %546 = vsyncpa [#allocation3 + $0x1], 1 }
 0x102   :  { %547 = vsyncpa [#allocation4], 1 }
 0x103   :  { %549 = vsyncpa [#allocation4 + $0x1], 1 }
 0x104   :  { %550 = vsyncpa [#allocation5], 1 }
 0x105   :  { %552 = vsyncpa [#allocation5 + $0x1], 1 }
 0x106   :  { %553 = vsyncpa [#allocation6], 1 }
 0x107   :  { %555 = vsyncpa [#allocation6 + $0x1], 1 }
 0x108   :  { %556 = vsyncpa [#allocation10], 1 }

</bundles_post_ra>
